<compile_context>
chip_gen: v7x
topology: tpu7x:2x2x1
jax: 0.10.0
libtpu: 0.0.40
codegen_flags: <defaults>
</compile_context>

<pallas_src>
import jax
import jax.numpy as jnp
from jax.experimental import pallas as pl
from jax.experimental.pallas import tpu as pltpu

EPS = 1e-5          # nn.BatchNorm1d default eps
LANE = 128          # TPU lane width (lane-dense feature padding)


def _ceil_to(x, m):
    return (x + m - 1) // m * m


def _pad2(a, rows, cols):
    out = jnp.zeros((rows, cols), a.dtype)
    return out.at[: a.shape[0], : a.shape[1]].set(a)


# ------------------------------ fused kernel --------------------------------

def _make_fused_kernel(n_hidden, has_out, bn_on_last):
    """Ref order: x, [wt_0, prm_0, ..., wt_{n-1}, prm_{n-1}], (wt_out, b_out)?, o.

    prm_i rows: 0 = linear bias (upstream BN shift already folded in),
                1 = PReLU alpha broadcast to a full feature row.
    Rows 2/3 (BN scale/shift) exist only on the LAST hidden layer when there
    is no output Linear to fold them into.  Padded feature columns of every
    weight / row are zero, so they stay exactly zero through every layer.
    """

    def kernel(x_ref, *refs):
        o_ref = refs[-1]
        h = x_ref[...]                       # already in matmul dtype (layer 0)
        idx = 0
        for li in range(n_hidden):           # unrolled at trace time
            wt = refs[idx][...]
            prm = refs[idx + 1][...]
            idx += 2
            # Linear (MXU, f32 accumulation)
            y = jnp.dot(h.astype(wt.dtype), wt,
                        preferred_element_type=jnp.float32)
            y = y + prm[0:1, :]
            # Dropout (eval mode) -> identity.  PReLU:
            y = jnp.where(y > 0, y, prm[1:2, :] * y)
            if bn_on_last and li == n_hidden - 1:
                # Only when there is no next layer to fold BN into.
                y = y * prm[2:3, :] + prm[3:4, :]
            h = y
        if has_out:
            wt = refs[idx][...]
            b = refs[idx + 1][...]
            h = jnp.dot(h.astype(wt.dtype), wt,
                        preferred_element_type=jnp.float32) + b[0:1, :]
        o_ref[...] = h.astype(o_ref.dtype)

    return kernel


# --------------------- one-time parameter preprocessing ---------------------

def prepare_dnn_params(hidden_params, out_params, matmul_dtype=jnp.bfloat16):
    """Hoisted off the hot path: fold BN of layer i into layer i+1's weight and
    bias, transpose + zero-pad + cast weights, pack (bias, alpha) per layer."""
    has_out = out_params is not None
    n_hidden = len(hidden_params)

    hidden = []
    final_dim = None
    pend_scale = None     # BN (scale, shift) of the previous layer, pending fold
    pend_shift = None

    for i, p in enumerate(hidden_params):
        w = p["w"].astype(jnp.float32)        # (dout, din)
        b = p["b"].astype(jnp.float32)
        dout, din = w.shape
        if pend_scale is not None:            # fold previous layer's BN
            b = b + w @ pend_shift
            w = w * pend_scale[None, :]
        din_p, dout_p = _ceil_to(din, LANE), _ceil_to(dout, LANE)
        wt = _pad2(w.T, din_p, dout_p).astype(matmul_dtype)

        scale = p["gamma"].astype(jnp.float32) * jax.lax.rsqrt(
            p["var"].astype(jnp.float32) + EPS)
        shift = p["beta"].astype(jnp.float32) - p["mean"].astype(jnp.float32) * scale
        alpha_row = jnp.broadcast_to(p["alpha"].astype(jnp.float32), (dout,))

        def row(v, dout=dout, dout_p=dout_p):
            return jnp.zeros((dout_p,), jnp.float32).at[:dout].set(
                v.astype(jnp.float32))

        is_last = (i == n_hidden - 1)
        if is_last and not has_out:
            # No next layer: keep BN as an in-kernel (scale, shift) epilogue.
            prm = jnp.stack([row(b), row(alpha_row), row(scale), row(shift)])
            pend_scale = pend_shift = None
        else:
            prm = jnp.stack([row(b), row(alpha_row)])
            pend_scale, pend_shift = scale, shift
        hidden.append({"wt": wt, "prm": prm})
        final_dim = dout

    out = None
    if has_out:
        w = out_params["w"].astype(jnp.float32)
        b = out_params["b"].astype(jnp.float32)
        dout, din = w.shape
        if pend_scale is not None:
            b = b + w @ pend_shift
            w = w * pend_scale[None, :]
        din_p, dout_p = _ceil_to(din, LANE), _ceil_to(dout, LANE)
        wt = _pad2(w.T, din_p, dout_p).astype(matmul_dtype)
        b_pad = jnp.zeros((1, dout_p), jnp.float32).at[0, :dout].set(b)
        out = {"wt": wt, "b": b_pad}
        final_dim = dout

    in_dim = (hidden_params[0]["w"].shape[1] if n_hidden
              else out_params["w"].shape[1])
    return {"hidden": hidden, "out": out,
            "final_dim": final_dim, "in_dim": in_dim,
            "in_dim_padded": _ceil_to(in_dim, LANE),
            "matmul_dtype": jnp.dtype(matmul_dtype),
            "bn_on_last": (n_hidden > 0 and not has_out)}


# ------------------------------- forward ------------------------------------

def _batch_tile_cap():
    # v6e / v7x MXUs are 256 wide -> a 256-row LHS tile feeds them fully;
    # 128-wide-MXU generations (v5e and older) keep the 128 cap.
    try:
        kind = jax.devices()[0].device_kind.lower()
    except Exception:
        kind = ""
    return 256 if ("v6" in kind or "v7" in kind) else 128


def _pick_batch_tile(B, sublane, cap):
    """Largest tile <= cap that divides the sublane-rounded batch, so ragged
    batches (e.g. B=130) are not padded up to a full 128/256 tile."""
    B_s = _ceil_to(B, sublane)
    tb = sublane
    for cand in range(sublane, min(cap, B_s) + 1, sublane):
        if B_s % cand == 0:
            tb = cand
    return tb, B_s


def dnn_forward_pallas(x, prepped):
    hidden, out = prepped["hidden"], prepped["out"]
    n_hidden, has_out = len(hidden), out is not None
    mm_dtype = prepped["matmul_dtype"]
    B, din = x.shape
    din_p = prepped["in_dim_padded"]
    dout = prepped["final_dim"]
    dout_p = out["wt"].shape[1] if has_out else hidden[-1]["wt"].shape[1]

    sublane = 16 if mm_dtype.itemsize < 4 else 8
    tb, B_p = _pick_batch_tile(B, sublane, _batch_tile_cap())
    n_tiles = B_p // tb

    # Host-side LHS prep: cast once to the matmul dtype so the first layer's
    # LHS is already MXU-ready; skip the pad copy when shapes already match.
    if B_p == B and din_p == din:
        x_p = x.astype(mm_dtype)
    else:
        x_p = jnp.zeros((B_p, din_p), mm_dtype).at[:B, :din].set(
            x.astype(mm_dtype))

    inputs = [x_p]
    for lp in hidden:
        inputs += [lp["wt"], lp["prm"]]
    if has_out:
        inputs += [out["wt"], out["b"]]

    weight_arrays = [lp["wt"] for lp in hidden] + ([out["wt"]] if has_out else [])
    param_arrays = [lp["prm"] for lp in hidden] + ([out["b"]] if has_out else [])
    widest = max([din_p] + [w.shape[1] for w in weight_arrays])

    kernel = _make_fused_kernel(n_hidden, has_out, prepped["bn_on_last"])

    def _call(single_buffer_weights):
        wbuf = 1 if single_buffer_weights else 2

        def const_spec(shape):
            # Weights/params never change across the batch grid; single-buffer
            # them so VMEM only holds one copy (index map constant => the
            # pipeline does not re-stream them per batch tile).
            if single_buffer_weights:
                return pl.BlockSpec(shape, lambda i: (0, 0),
                                    pipeline_mode=pl.Buffered(1))
            return pl.BlockSpec(shape, lambda i: (0, 0))

        in_specs = [pl.BlockSpec((tb, din_p), lambda i: (i, 0))]
        for lp in hidden:
            in_specs += [const_spec(lp["wt"].shape), const_spec(lp["prm"].shape)]
        if has_out:
            in_specs += [const_spec(out["wt"].shape), const_spec(out["b"].shape)]

        # Explicit VMEM budget: resident weights/params (x buffer count) +
        # double-buffered x/out tiles + f32 activation headroom.
        w_bytes = sum(int(w.size) * w.dtype.itemsize for w in weight_arrays)
        p_bytes = sum(int(p.size) * p.dtype.itemsize for p in param_arrays)
        io_bytes = 2 * (tb * din_p * mm_dtype.itemsize + tb * dout_p * 4)
        act_bytes = 4 * tb * widest * 4
        footprint = wbuf * (w_bytes + p_bytes) + io_bytes + act_bytes
        vmem_limit = int(min(max(2 * footprint, 16 << 20), 64 << 20))
        # TODO(synk): if wbuf*(w_bytes+p_bytes) grows past ~1/3 of per-core
        # VMEM (notably v7x @ 64 MiB, v5e's 16 MiB scoped default), switch the
        # big layers to a K/N-tiled accumulator grid instead of whole-matrix
        # resident blocks.

        return pl.pallas_call(
            kernel,
            out_shape=jax.ShapeDtypeStruct((B_p, dout_p), jnp.float32),
            grid=(n_tiles,),
            in_specs=in_specs,
            out_specs=pl.BlockSpec((tb, dout_p), lambda i: (i, 0)),
            compiler_params=pltpu.CompilerParams(
                dimension_semantics=("parallel",),   # batch tiles independent
                vmem_limit_bytes=vmem_limit),
        )(*inputs)

    try:
        y_p = jax.block_until_ready(_call(True))
    except Exception:
        # Fallback if this JAX build rejects pipeline_mode=pl.Buffered(1);
        # constant index maps still avoid per-step re-DMA, just double-buffer.
        y_p = _call(False)

    if B_p == B and dout_p == dout:
        return y_p
    return y_p[:B, :dout]


# ----------------------- parameter init / JAX reference ---------------------

def init_dnn_params(key, input_dim, output_dim, dnn_dims, output_layer=True):
    """Deterministic synthetic init; shapes follow the PyTorch module __init__."""
    hidden = []
    d_in = input_dim
    for d in dnn_dims:
        key, k1, k2, k3, k4, k5, k6 = jax.random.split(key, 7)
        bound = 1.0 / (d_in ** 0.5)
        hidden.append(dict(
            w=jax.random.uniform(k1, (d, d_in), jnp.float32, -bound, bound),
            b=jax.random.uniform(k2, (d,), jnp.float32, -bound, bound),
            alpha=jnp.full((1,), 0.25, jnp.float32),             # PReLU default
            gamma=1.0 + 0.1 * jax.random.normal(k3, (d,), jnp.float32),
            beta=0.1 * jax.random.normal(k4, (d,), jnp.float32),
            mean=0.1 * jax.random.normal(k5, (d,), jnp.float32),
            var=jax.random.uniform(k6, (d,), jnp.float32, 0.5, 1.5),
        ))
        d_in = d
    out_params = None
    if output_layer:
        key, k1, k2 = jax.random.split(key, 3)
        bound = 1.0 / (d_in ** 0.5)
        out_params = dict(
            w=jax.random.uniform(k1, (output_dim, d_in), jnp.float32, -bound, bound),
            b=jax.random.uniform(k2, (output_dim,), jnp.float32, -bound, bound),
        )
    return hidden, out_params


def dnn_forward_ref(x, hidden_params, out_params):
    for p in hidden_params:
        y = x @ p["w"].T + p["b"]
        y = jnp.where(y > 0, y, p["alpha"] * y)
        y = (y - p["mean"]) * jax.lax.rsqrt(p["var"] + EPS) * p["gamma"] + p["beta"]
        x = y
    if out_params is not None:
        x = x @ out_params["w"].T + out_params["b"]
    return x


# --------------------------------- main --------------------------------------

if __name__ == "__main__":
    key = jax.random.PRNGKey(0)
    batch, input_dim, output_dim = 16, 16, 8
    dnn_dims = (32, 64)
    dropout = 0.2  # eval mode -> identity

    key, kx, kp = jax.random.split(key, 3)
    x = jax.random.normal(kx, (batch, input_dim), jnp.float32)
    hidden_raw, out_raw = init_dnn_params(kp, input_dim, output_dim, dnn_dims)

    ref = dnn_forward_ref(x, hidden_raw, out_raw)

    # f32-matmul path (BN folded at prep time; matches the eval-mode reference
    # up to f32 reassociation error).
    prepped_f32 = prepare_dnn_params(hidden_raw, out_raw, matmul_dtype=jnp.float32)
    out_f32 = jax.block_until_ready(dnn_forward_pallas(x, prepped_f32))
    assert out_f32.shape == (batch, output_dim)
    assert jnp.allclose(out_f32, ref, rtol=1e-4, atol=1e-4), "f32 mismatch vs. reference"

    # bf16-matmul path (default on every generation: bf16 MXU inputs, f32
    # accumulate, f32 elementwise epilogue).  Tolerance reflects bf16 inputs;
    # re-validate for deeper/wider production stacks.
    prepped_bf16 = prepare_dnn_params(hidden_raw, out_raw, matmul_dtype=jnp.bfloat16)
    out_bf16 = jax.block_until_ready(dnn_forward_pallas(x, prepped_bf16))
    assert out_bf16.shape == (batch, output_dim)
    assert jnp.allclose(out_bf16, ref, rtol=2e-2, atol=2e-2), "bf16 mismatch vs. reference"

    print("KERNEL_OK")
</pallas_src>

<mosaic_0001>
module attributes {stable_mosaic.version = 11 : i64} {
  func.func @kernel(%arg0: i32, %arg1: memref<16x128xf32, #tpu.memory_space<vmem>>, %arg2: memref<128x128xf32, #tpu.memory_space<vmem>>, %arg3: memref<2x128xf32, #tpu.memory_space<vmem>>, %arg4: memref<128x128xf32, #tpu.memory_space<vmem>>, %arg5: memref<2x128xf32, #tpu.memory_space<vmem>>, %arg6: memref<128x128xf32, #tpu.memory_space<vmem>>, %arg7: memref<1x128xf32, #tpu.memory_space<vmem>>, %arg8: memref<16x128xf32, #tpu.memory_space<vmem>>) attributes {dimension_semantics = [#tpu.dimension_semantics<parallel>], iteration_bounds = array<i64: 1>, scalar_prefetch = 0 : i64, scratch_operands = 0 : i64, tpu.core_type = #tpu.core_type<tc>, window_params = [{transform_indices = @transform_0, window_bounds = array<i64: 16, 128>}, {pipeline_mode = #tpu.pipeline_mode<synchronous>, transform_indices = @transform_1, window_bounds = array<i64: 128, 128>}, {pipeline_mode = #tpu.pipeline_mode<synchronous>, transform_indices = @transform_2, window_bounds = array<i64: 2, 128>}, {pipeline_mode = #tpu.pipeline_mode<synchronous>, transform_indices = @transform_3, window_bounds = array<i64: 128, 128>}, {pipeline_mode = #tpu.pipeline_mode<synchronous>, transform_indices = @transform_4, window_bounds = array<i64: 2, 128>}, {pipeline_mode = #tpu.pipeline_mode<synchronous>, transform_indices = @transform_5, window_bounds = array<i64: 128, 128>}, {pipeline_mode = #tpu.pipeline_mode<synchronous>, transform_indices = @transform_6, window_bounds = array<i64: 1, 128>}, {transform_indices = @transform_7, window_bounds = array<i64: 16, 128>}]} {
    %c0 = arith.constant 0 : index
    %c0_0 = arith.constant 0 : index
    %0 = vector.load %arg1[%c0, %c0_0] : memref<16x128xf32, #tpu.memory_space<vmem>>, vector<16x128xf32>
    %c0_1 = arith.constant 0 : index
    %c0_2 = arith.constant 0 : index
    %1 = vector.load %arg2[%c0_1, %c0_2] : memref<128x128xf32, #tpu.memory_space<vmem>>, vector<128x128xf32>
    %c0_3 = arith.constant 0 : index
    %c0_4 = arith.constant 0 : index
    %2 = vector.load %arg3[%c0_3, %c0_4] : memref<2x128xf32, #tpu.memory_space<vmem>>, vector<2x128xf32>
    %cst = arith.constant dense<0.000000e+00> : vector<16x128xf32>
    %3 = tpu.matmul %0, %1, %cst {dimension_numbers = #tpu.dot_dimension_numbers<[1], [0], [0], [1], [0, 0, 1, 1], [], []>} : vector<16x128xf32>, vector<128x128xf32>, vector<16x128xf32> -> vector<16x128xf32>
    %4 = vector.extract_strided_slice %2 {offsets = [0, 0], sizes = [1, 128], strides = [1, 1]} : vector<2x128xf32> to vector<1x128xf32>
    %5 = vector.broadcast %4 : vector<1x128xf32> to vector<16x128xf32>
    %6 = arith.addf %3, %5 : vector<16x128xf32>
    %cst_5 = arith.constant 0.000000e+00 : f32
    %7 = vector.broadcast %cst_5 : f32 to vector<16x128xf32>
    %8 = arith.cmpf ogt, %6, %7 : vector<16x128xf32>
    %9 = vector.extract_strided_slice %2 {offsets = [1, 0], sizes = [1, 128], strides = [1, 1]} : vector<2x128xf32> to vector<1x128xf32>
    %10 = vector.broadcast %9 : vector<1x128xf32> to vector<16x128xf32>
    %11 = arith.mulf %10, %6 : vector<16x128xf32>
    %12 = arith.select %8, %6, %11 : vector<16x128xi1>, vector<16x128xf32>
    %c0_6 = arith.constant 0 : index
    %c0_7 = arith.constant 0 : index
    %13 = vector.load %arg4[%c0_6, %c0_7] : memref<128x128xf32, #tpu.memory_space<vmem>>, vector<128x128xf32>
    %c0_8 = arith.constant 0 : index
    %c0_9 = arith.constant 0 : index
    %14 = vector.load %arg5[%c0_8, %c0_9] : memref<2x128xf32, #tpu.memory_space<vmem>>, vector<2x128xf32>
    %cst_10 = arith.constant dense<0.000000e+00> : vector<16x128xf32>
    %15 = tpu.matmul %12, %13, %cst_10 {dimension_numbers = #tpu.dot_dimension_numbers<[1], [0], [0], [1], [0, 0, 1, 1], [], []>} : vector<16x128xf32>, vector<128x128xf32>, vector<16x128xf32> -> vector<16x128xf32>
    %16 = vector.extract_strided_slice %14 {offsets = [0, 0], sizes = [1, 128], strides = [1, 1]} : vector<2x128xf32> to vector<1x128xf32>
    %17 = vector.broadcast %16 : vector<1x128xf32> to vector<16x128xf32>
    %18 = arith.addf %15, %17 : vector<16x128xf32>
    %cst_11 = arith.constant 0.000000e+00 : f32
    %19 = vector.broadcast %cst_11 : f32 to vector<16x128xf32>
    %20 = arith.cmpf ogt, %18, %19 : vector<16x128xf32>
    %21 = vector.extract_strided_slice %14 {offsets = [1, 0], sizes = [1, 128], strides = [1, 1]} : vector<2x128xf32> to vector<1x128xf32>
    %22 = vector.broadcast %21 : vector<1x128xf32> to vector<16x128xf32>
    %23 = arith.mulf %22, %18 : vector<16x128xf32>
    %24 = arith.select %20, %18, %23 : vector<16x128xi1>, vector<16x128xf32>
    %c0_12 = arith.constant 0 : index
    %c0_13 = arith.constant 0 : index
    %25 = vector.load %arg6[%c0_12, %c0_13] : memref<128x128xf32, #tpu.memory_space<vmem>>, vector<128x128xf32>
    %c0_14 = arith.constant 0 : index
    %c0_15 = arith.constant 0 : index
    %26 = vector.load %arg7[%c0_14, %c0_15] : memref<1x128xf32, #tpu.memory_space<vmem>>, vector<1x128xf32>
    %cst_16 = arith.constant dense<0.000000e+00> : vector<16x128xf32>
    %27 = tpu.matmul %24, %25, %cst_16 {dimension_numbers = #tpu.dot_dimension_numbers<[1], [0], [0], [1], [0, 0, 1, 1], [], []>} : vector<16x128xf32>, vector<128x128xf32>, vector<16x128xf32> -> vector<16x128xf32>
    %28 = vector.broadcast %26 : vector<1x128xf32> to vector<16x128xf32>
    %29 = arith.addf %27, %28 : vector<16x128xf32>
    %c0_17 = arith.constant 0 : index
    %c0_18 = arith.constant 0 : index
    %30 = vector.load %arg8[%c0_17, %c0_18] : memref<16x128xf32, #tpu.memory_space<vmem>>, vector<16x128xf32>
    tpu.vector_store %arg8[%c0_17, %c0_18], %29 {strides = array<i32>} : memref<16x128xf32, #tpu.memory_space<vmem>>, vector<16x128xf32>,
    return
  }
  func.func @transform_0(%arg0: i32) -> (i32, i32) {
    %c0_i32 = arith.constant 0 : i32
    %c0_i32_0 = arith.constant 0 : i32
    return %arg0, %c0_i32 : i32, i32
  }
  func.func @transform_1(%arg0: i32) -> (i32, i32) {
    %c0_i32 = arith.constant 0 : i32
    %c0_i32_0 = arith.constant 0 : i32
    %c0_i32_1 = arith.constant 0 : i32
    return %c0_i32, %c0_i32_0 : i32, i32
  }
  func.func @transform_2(%arg0: i32) -> (i32, i32) {
    %c0_i32 = arith.constant 0 : i32
    %c0_i32_0 = arith.constant 0 : i32
    %c0_i32_1 = arith.constant 0 : i32
    return %c0_i32, %c0_i32_0 : i32, i32
  }
  func.func @transform_3(%arg0: i32) -> (i32, i32) {
    %c0_i32 = arith.constant 0 : i32
    %c0_i32_0 = arith.constant 0 : i32
    %c0_i32_1 = arith.constant 0 : i32
    return %c0_i32, %c0_i32_0 : i32, i32
  }
  func.func @transform_4(%arg0: i32) -> (i32, i32) {
    %c0_i32 = arith.constant 0 : i32
    %c0_i32_0 = arith.constant 0 : i32
    %c0_i32_1 = arith.constant 0 : i32
    return %c0_i32, %c0_i32_0 : i32, i32
  }
  func.func @transform_5(%arg0: i32) -> (i32, i32) {
    %c0_i32 = arith.constant 0 : i32
    %c0_i32_0 = arith.constant 0 : i32
    %c0_i32_1 = arith.constant 0 : i32
    return %c0_i32, %c0_i32_0 : i32, i32
  }
  func.func @transform_6(%arg0: i32) -> (i32, i32) {
    %c0_i32 = arith.constant 0 : i32
    %c0_i32_0 = arith.constant 0 : i32
    %c0_i32_1 = arith.constant 0 : i32
    return %c0_i32, %c0_i32_0 : i32, i32
  }
  func.func @transform_7(%arg0: i32) -> (i32, i32) {
    %c0_i32 = arith.constant 0 : i32
    %c0_i32_0 = arith.constant 0 : i32
    return %arg0, %c0_i32 : i32, i32
  }
}

module attributes {stable_mosaic.version = 11 : i64} {
  func.func @kernel(%arg0: i32, %arg1: memref<16x128xf32, #tpu.memory_space<vmem>>, %arg2: memref<128x128xf32, #tpu.memory_space<vmem>>, %arg3: memref<2x128xf32, #tpu.memory_space<vmem>>, %arg4: memref<128x128xf32, #tpu.memory_space<vmem>>, %arg5: memref<2x128xf32, #tpu.memory_space<vmem>>, %arg6: memref<128x128xf32, #tpu.memory_space<vmem>>, %arg7: memref<1x128xf32, #tpu.memory_space<vmem>>, %arg8: memref<16x128xf32, #tpu.memory_space<vmem>>) attributes {dimension_semantics = [#tpu.dimension_semantics<parallel>], iteration_bounds = array<i64: 1>, scalar_prefetch = 0 : i64, scratch_operands = 0 : i64, tpu.core_type = #tpu.core_type<tc>, window_params = [{transform_indices = @transform_0, window_bounds = array<i64: 16, 128>}, {pipeline_mode = #tpu.pipeline_mode<synchronous>, transform_indices = @transform_1, window_bounds = array<i64: 128, 128>}, {pipeline_mode = #tpu.pipeline_mode<synchronous>, transform_indices = @transform_2, window_bounds = array<i64: 2, 128>}, {pipeline_mode = #tpu.pipeline_mode<synchronous>, transform_indices = @transform_3, window_bounds = array<i64: 128, 128>}, {pipeline_mode = #tpu.pipeline_mode<synchronous>, transform_indices = @transform_4, window_bounds = array<i64: 2, 128>}, {pipeline_mode = #tpu.pipeline_mode<synchronous>, transform_indices = @transform_5, window_bounds = array<i64: 128, 128>}, {pipeline_mode = #tpu.pipeline_mode<synchronous>, transform_indices = @transform_6, window_bounds = array<i64: 1, 128>}, {transform_indices = @transform_7, window_bounds = array<i64: 16, 128>}]} {
    %c0 = arith.constant 0 : index
    %c0_0 = arith.constant 0 : index
    %0 = vector.load %arg1[%c0, %c0_0] : memref<16x128xf32, #tpu.memory_space<vmem>>, vector<16x128xf32>
    %c0_1 = arith.constant 0 : index
    %c0_2 = arith.constant 0 : index
    %1 = vector.load %arg2[%c0_1, %c0_2] : memref<128x128xf32, #tpu.memory_space<vmem>>, vector<128x128xf32>
    %c0_3 = arith.constant 0 : index
    %c0_4 = arith.constant 0 : index
    %2 = vector.load %arg3[%c0_3, %c0_4] : memref<2x128xf32, #tpu.memory_space<vmem>>, vector<2x128xf32>
    %cst = arith.constant dense<0.000000e+00> : vector<16x128xf32>
    %3 = tpu.matmul %0, %1, %cst {dimension_numbers = #tpu.dot_dimension_numbers<[1], [0], [0], [1], [0, 0, 1, 1], [], []>} : vector<16x128xf32>, vector<128x128xf32>, vector<16x128xf32> -> vector<16x128xf32>
    %4 = vector.extract_strided_slice %2 {offsets = [0, 0], sizes = [1, 128], strides = [1, 1]} : vector<2x128xf32> to vector<1x128xf32>
    %5 = vector.broadcast %4 : vector<1x128xf32> to vector<16x128xf32>
    %6 = arith.addf %3, %5 : vector<16x128xf32>
    %cst_5 = arith.constant 0.000000e+00 : f32
    %7 = vector.broadcast %cst_5 : f32 to vector<16x128xf32>
    %8 = arith.cmpf ogt, %6, %7 : vector<16x128xf32>
    %9 = vector.extract_strided_slice %2 {offsets = [1, 0], sizes = [1, 128], strides = [1, 1]} : vector<2x128xf32> to vector<1x128xf32>
    %10 = vector.broadcast %9 : vector<1x128xf32> to vector<16x128xf32>
    %11 = arith.mulf %10, %6 : vector<16x128xf32>
    %12 = arith.select %8, %6, %11 : vector<16x128xi1>, vector<16x128xf32>
    %c0_6 = arith.constant 0 : index
    %c0_7 = arith.constant 0 : index
    %13 = vector.load %arg4[%c0_6, %c0_7] : memref<128x128xf32, #tpu.memory_space<vmem>>, vector<128x128xf32>
    %c0_8 = arith.constant 0 : index
    %c0_9 = arith.constant 0 : index
    %14 = vector.load %arg5[%c0_8, %c0_9] : memref<2x128xf32, #tpu.memory_space<vmem>>, vector<2x128xf32>
    %cst_10 = arith.constant dense<0.000000e+00> : vector<16x128xf32>
    %15 = tpu.matmul %12, %13, %cst_10 {dimension_numbers = #tpu.dot_dimension_numbers<[1], [0], [0], [1], [0, 0, 1, 1], [], []>} : vector<16x128xf32>, vector<128x128xf32>, vector<16x128xf32> -> vector<16x128xf32>
    %16 = vector.extract_strided_slice %14 {offsets = [0, 0], sizes = [1, 128], strides = [1, 1]} : vector<2x128xf32> to vector<1x128xf32>
    %17 = vector.broadcast %16 : vector<1x128xf32> to vector<16x128xf32>
    %18 = arith.addf %15, %17 : vector<16x128xf32>
    %cst_11 = arith.constant 0.000000e+00 : f32
    %19 = vector.broadcast %cst_11 : f32 to vector<16x128xf32>
    %20 = arith.cmpf ogt, %18, %19 : vector<16x128xf32>
    %21 = vector.extract_strided_slice %14 {offsets = [1, 0], sizes = [1, 128], strides = [1, 1]} : vector<2x128xf32> to vector<1x128xf32>
    %22 = vector.broadcast %21 : vector<1x128xf32> to vector<16x128xf32>
    %23 = arith.mulf %22, %18 : vector<16x128xf32>
    %24 = arith.select %20, %18, %23 : vector<16x128xi1>, vector<16x128xf32>
    %c0_12 = arith.constant 0 : index
    %c0_13 = arith.constant 0 : index
    %25 = vector.load %arg6[%c0_12, %c0_13] : memref<128x128xf32, #tpu.memory_space<vmem>>, vector<128x128xf32>
    %c0_14 = arith.constant 0 : index
    %c0_15 = arith.constant 0 : index
    %26 = vector.load %arg7[%c0_14, %c0_15] : memref<1x128xf32, #tpu.memory_space<vmem>>, vector<1x128xf32>
    %cst_16 = arith.constant dense<0.000000e+00> : vector<16x128xf32>
    %27 = tpu.matmul %24, %25, %cst_16 {dimension_numbers = #tpu.dot_dimension_numbers<[1], [0], [0], [1], [0, 0, 1, 1], [], []>} : vector<16x128xf32>, vector<128x128xf32>, vector<16x128xf32> -> vector<16x128xf32>
    %28 = vector.broadcast %26 : vector<1x128xf32> to vector<16x128xf32>
    %29 = arith.addf %27, %28 : vector<16x128xf32>
    %c0_17 = arith.constant 0 : index
    %c0_18 = arith.constant 0 : index
    %30 = vector.load %arg8[%c0_17, %c0_18] : memref<16x128xf32, #tpu.memory_space<vmem>>, vector<16x128xf32>
    tpu.vector_store %arg8[%c0_17, %c0_18], %29 {strides = array<i32>} : memref<16x128xf32, #tpu.memory_space<vmem>>, vector<16x128xf32>,
    return
  }
  func.func @transform_0(%arg0: i32) -> (i32, i32) {
    %c0_i32 = arith.constant 0 : i32
    %c0_i32_0 = arith.constant 0 : i32
    return %arg0, %c0_i32 : i32, i32
  }
  func.func @transform_1(%arg0: i32) -> (i32, i32) {
    %c0_i32 = arith.constant 0 : i32
    %c0_i32_0 = arith.constant 0 : i32
    %c0_i32_1 = arith.constant 0 : i32
    return %c0_i32, %c0_i32_0 : i32, i32
  }
  func.func @transform_2(%arg0: i32) -> (i32, i32) {
    %c0_i32 = arith.constant 0 : i32
    %c0_i32_0 = arith.constant 0 : i32
    %c0_i32_1 = arith.constant 0 : i32
    return %c0_i32, %c0_i32_0 : i32, i32
  }
  func.func @transform_3(%arg0: i32) -> (i32, i32) {
    %c0_i32 = arith.constant 0 : i32
    %c0_i32_0 = arith.constant 0 : i32
    %c0_i32_1 = arith.constant 0 : i32
    return %c0_i32, %c0_i32_0 : i32, i32
  }
  func.func @transform_4(%arg0: i32) -> (i32, i32) {
    %c0_i32 = arith.constant 0 : i32
    %c0_i32_0 = arith.constant 0 : i32
    %c0_i32_1 = arith.constant 0 : i32
    return %c0_i32, %c0_i32_0 : i32, i32
  }
  func.func @transform_5(%arg0: i32) -> (i32, i32) {
    %c0_i32 = arith.constant 0 : i32
    %c0_i32_0 = arith.constant 0 : i32
    %c0_i32_1 = arith.constant 0 : i32
    return %c0_i32, %c0_i32_0 : i32, i32
  }
  func.func @transform_6(%arg0: i32) -> (i32, i32) {
    %c0_i32 = arith.constant 0 : i32
    %c0_i32_0 = arith.constant 0 : i32
    %c0_i32_1 = arith.constant 0 : i32
    return %c0_i32, %c0_i32_0 : i32, i32
  }
  func.func @transform_7(%arg0: i32) -> (i32, i32) {
    %c0_i32 = arith.constant 0 : i32
    %c0_i32_0 = arith.constant 0 : i32
    return %arg0, %c0_i32 : i32, i32
  }
}

</mosaic_0001>

<bundles_post_ra>
// kernel: tpu_custom_call.1
= control target key start
LH: loop header
LB: loop body
LE: loop exit
PB: predicated region body
PF: predicated region fallthrough
CT: control target
= control target key end

     0   :  { %12 = vsyncpa [#allocation3], 0  ;;  %s941_s0 = inlined_call_operand.hbm [shape: f32[16,128], index: 0, kind: input, shape index: {}]   ;;  %s942_s1 = inlined_call_operand.hbm [shape: f32[128,128], index: 1, kind: input, shape index: {}]   ;;  %s943_s2 = inlined_call_operand.vmem [shape: f32[2,128], index: 2, kind: input, shape index: {}]   ;;  %s944_s3 = inlined_call_operand.hbm [shape: f32[128,128], index: 3, kind: input, shape index: {}]   ;;  %s945_s4 = inlined_call_operand.vmem [shape: f32[2,128], index: 4, kind: input, shape index: {}]   ;;  %s946_s5 = inlined_call_operand.hbm [shape: f32[128,128], index: 5, kind: input, shape index: {}]   ;;  %s947_s6 = inlined_call_operand.vmem [shape: f32[1,128], index: 6, kind: input, shape index: {}]   ;;  %s948_s7 = inlined_call_operand.hbm [shape: f32[16,128], index: 7, kind: output, shape index: {}]  }
   0x1   :  { %13 = vsyncpa [#allocation6], 0 }
   0x2   :  { %14 = vsyncpa [#allocation9], 0 }
   0x3   :  { %15 = vsyncpa [#allocation4], 0  ;;  %s796_s24 = smov [#allocation5]   ;;  %s797_s26 = smov [#allocation2]  }
   0x4   :  { %s33_s25 = sshll.u32 %s796_s24, 4  ;;  %s21_s27 = sshll.u32 %s797_s26, 4  ;;  %s34_s25 = int_to_ptr.vmem [resolvable:$true] %s33_s25  ;;  %s843_s27 = int_to_ptr.vmem [resolvable:$true] %s21_s27 }
   0x5   :  { %s678_s30 = scalar_lea.hbm %s942_s1, 2048 }
   0x6   :  { %p679_p0 = scmp.ne.s32.totalorder %s942_s1, %s678_s30  ;;  %p682_p1 = scmp.lt.u32.totalorder %s678_s30, %s942_s1 }
   0x8   :  { %p684_p2 = pnand %p682_p1, %p679_p0 }
   0xa   :  { %687 = shalt.err (!%p684_p2)
}
   0xb   :  { %s688_s12 = scalar_lea.vmem %s34_s25, 2048  ;;  %p693_p4 = scmp.lt.s32.totalorder %s34_s25, %s34_s25 }
   0xc   :  { %p689_p3 = scmp.ne.s32.totalorder %s34_s25, %s688_s12  ;;  %p694_p5 = scmp.lt.s32.totalorder %s688_s12, %s688_s12 }
   0xe   :  { %p695_p6 = por %p694_p5, %p693_p4 }
  0x10   :  { %p696_p7 = pnand %p695_p6, %p689_p3 }
  0x12   :  { %699 = shalt.err (!%p696_p7)
}
  0x13   :  { %s798_s13 = smov 128   ;;  %s799_s14 = smov 8  }
  0x14   :  { %39 = dma.hbm_to_vmem [thread:$0]  %s942_s1, 2048, %s34_s25, [#allocation6], %s798_s13, %s798_s13, %s799_s14  }
  0x15   :  { %s700_s19 = scalar_lea.hbm %s941_s0, 256 }
  0x16   :  { %p701_p8 = scmp.ne.s32.totalorder %s941_s0, %s700_s19  ;;  %p704_p9 = scmp.lt.u32.totalorder %s700_s19, %s941_s0 }
  0x18   :  { %p706_p10 = pnand %p704_p9, %p701_p8 }
  0x1a   :  { %709 = shalt.err (!%p706_p10)
}
  0x1b   :  { %s710_s24 = scalar_lea.vmem %s843_s27, 256  ;;  %p715_p12 = scmp.lt.s32.totalorder %s843_s27, %s843_s27 }
  0x1c   :  { %p711_p11 = scmp.ne.s32.totalorder %s843_s27, %s710_s24  ;;  %p716_p13 = scmp.lt.s32.totalorder %s710_s24, %s710_s24 }
  0x1e   :  { %p717_p0 = por %p716_p13, %p715_p12 }
  0x20   :  { %p718_p1 = pnand %p717_p0, %p711_p11 }
  0x22   :  { %721 = shalt.err (!%p718_p1)
}
  0x23   :  { %27 = dma.hbm_to_vmem [thread:$0]  %s941_s0, 256, %s843_s27, [#allocation3], %s798_s13, %s798_s13, %s799_s14  }
  0x24   :  { %s800_s26 = smov [#allocation7]   ;;  %s801_s29 = smov [#allocation8]  }
  0x25   :  { %s47_s28 = sshll.u32 %s800_s26, 4  ;;  %s61_s30 = sshll.u32 %s801_s29, 4  ;;  %s48_s28 = int_to_ptr.vmem [resolvable:$true] %s47_s28  ;;  %s880_s30 = int_to_ptr.vmem [resolvable:$true] %s61_s30 }
  0x26   :  { %s722_s10 = scalar_lea.hbm %s944_s3, 2048 }
  0x27   :  { %p723_p2 = scmp.ne.s32.totalorder %s944_s3, %s722_s10  ;;  %p726_p3 = scmp.lt.u32.totalorder %s722_s10, %s944_s3 }
  0x29   :  { %p728_p4 = pnand %p726_p3, %p723_p2 }
  0x2b   :  { %731 = shalt.err (!%p728_p4)
}
  0x2c   :  { %s732_s0 = scalar_lea.vmem %s48_s28, 2048  ;;  %p737_p6 = scmp.lt.s32.totalorder %s48_s28, %s48_s28 }
  0x2d   :  { %p733_p5 = scmp.ne.s32.totalorder %s48_s28, %s732_s0  ;;  %p738_p7 = scmp.lt.s32.totalorder %s732_s0, %s732_s0 }
  0x2f   :  { %p739_p8 = por %p738_p7, %p737_p6 }
  0x31   :  { %p740_p9 = pnand %p739_p8, %p733_p5 }
  0x33   :  { %743 = shalt.err (!%p740_p9)
}
  0x34   :  { %53 = dma.hbm_to_vmem [thread:$0]  %s944_s3, 2048, %s48_s28, [#allocation6], %s798_s13, %s798_s13, %s799_s14  }
  0x35   :  { %s744_s20 = scalar_lea.hbm %s946_s5, 2048 }
  0x36   :  { %p745_p10 = scmp.ne.s32.totalorder %s946_s5, %s744_s20  ;;  %p748_p11 = scmp.lt.u32.totalorder %s744_s20, %s946_s5 }
  0x38   :  { %p750_p12 = pnand %p748_p11, %p745_p10 }
  0x3a   :  { %753 = shalt.err (!%p750_p12)
}
  0x3b   :  { %s754_s1 = scalar_lea.vmem %s880_s30, 2048  ;;  %p759_p0 = scmp.lt.s32.totalorder %s880_s30, %s880_s30 }
  0x3c   :  { %p755_p13 = scmp.ne.s32.totalorder %s880_s30, %s754_s1  ;;  %p760_p1 = scmp.lt.s32.totalorder %s754_s1, %s754_s1 }
  0x3e   :  { %p761_p2 = por %p760_p1, %p759_p0 }
  0x40   :  { %p762_p3 = pnand %p761_p2, %p755_p13 }
  0x42   :  { %765 = shalt.err (!%p762_p3)
}
  0x43   :  { %67 = dma.hbm_to_vmem [thread:$0]  %s946_s5, 2048, %s880_s30, [#allocation9], %s798_s13, %s798_s13, %s799_s14  }
  0x44   :  { %788 = dma.done.wait [#allocation3], 256  }
  0x45   :  { %789 = vsyncadd [#allocation3], 4294967040 }
  0x46   :  { %790 = dma.done.wait [#allocation6], 4096  }
  0x47   :  { %791 = vsyncadd [#allocation6], 4294963200 }
  0x48   :  { %792 = dma.done.wait [#allocation9], 2048  }
  0x49   :  { %793 = vsyncadd [#allocation9], 4294965248  ;;  %v84_v0 = vld [vmem:[#allocation5] sm:$0xff]  ;;  %v85_v1 = vld [vmem:[#allocation5 + $0x8] sm:$0xff]  ;;  %s802_s8 = smov [#allocation10]  }
  0x4a   :  { %v86_v2 = vld [vmem:[#allocation5 + $0x10] sm:$0xff]  ;;  %v575_v3 = vpack.c.bf16 %v85_v1, %v84_v0  ;;  %v87_v4 = vld [vmem:[#allocation5 + $0x18] sm:$0xff]  ;;  %v88_v6 = vld [vmem:[#allocation5 + $0x20] sm:$0xff] }
  0x4b   :  { %v579_v5 = vpack.c.bf16 %v87_v4, %v86_v2  ;;  %v89_v7 = vld [vmem:[#allocation5 + $0x28] sm:$0xff]  ;;  %v90_v9 = vld [vmem:[#allocation5 + $0x30] sm:$0xff]  ;;  %v91_v10 = vld [vmem:[#allocation5 + $0x38] sm:$0xff]  ;;  %v101_v4 = vlaneseq }
  0x4c   :  { %576 = vmatprep.subr.bf16.mxu0 %v575_v3  ;;  %v583_v8 = vpack.c.bf16 %v89_v7, %v88_v6  ;;  %v82_v11 = vld [vmem:[#allocation2] sm:$0xff]  ;;  %v190_v12 = vld [vmem:[#allocation7] sm:$0xff]  ;;  %v191_v13 = vld [vmem:[#allocation7 + $0x8] sm:$0xff]  ;;  %v587_v20 = vpack.c.bf16 %v91_v10, %v90_v9 }
  0x4d   :  { %578 = vmatpush3.bf16.msra.mxu0 %v575_v3  ;;  %502 = vmatprep.mubr.f32.mxu0 %v82_v11  ;;  %v192_v14 = vld [vmem:[#allocation7 + $0x10] sm:$0xff]  ;;  %v607_v15 = vpack.c.bf16 %v191_v13, %v190_v12  ;;  %v193_v16 = vld [vmem:[#allocation7 + $0x18] sm:$0xff]  ;;  %v194_v18 = vld [vmem:[#allocation7 + $0x20] sm:$0xff] }
  0x4e   :  { %580 = vmatprep.subr.bf16.mxu0 %v579_v5  ;;  %v611_v17 = vpack.c.bf16 %v193_v16, %v192_v14  ;;  %v195_v19 = vld [vmem:[#allocation7 + $0x28] sm:$0xff]  ;;  %v92_v21 = vld [vmem:[#allocation5 + $0x40] sm:$0xff]  ;;  %v196_v24 = vld [vmem:[#allocation7 + $0x30] sm:$0xff] }
  0x4f   :  { %608 = vmatprep.subr.bf16.mxu1 %v607_v15  ;;  %v93_v22 = vld [vmem:[#allocation5 + $0x48] sm:$0xff]  ;;  %v615_v23 = vpack.c.bf16 %v195_v19, %v194_v18  ;;  %v197_v25 = vld [vmem:[#allocation7 + $0x38] sm:$0xff]  ;;  %v94_v27 = vld [vmem:[#allocation5 + $0x50] sm:$0xff] }
  0x50   :  { %610 = vmatpush3.bf16.msra.mxu1 %v607_v15  ;;  %v591_v26 = vpack.c.bf16 %v93_v22, %v92_v21  ;;  %v95_v28 = vld [vmem:[#allocation5 + $0x58] sm:$0xff]  ;;  %v619_v29 = vpack.c.bf16 %v197_v25, %v196_v24  ;;  %v198_v30 = vld [vmem:[#allocation7 + $0x40] sm:$0xff]  ;;  %v199_v31 = vld [vmem:[#allocation7 + $0x48] sm:$0xff] }
  0x51   :  { %582 = vmatpush3.bf16.msra.mxu0 %v579_v5  ;;  %612 = vmatprep.subr.bf16.mxu1 %v611_v17  ;;  %v595_v32 = vpack.c.bf16 %v95_v28, %v94_v27  ;;  %v96_v33 = vld [vmem:[#allocation5 + $0x60] sm:$0xff]  ;;  %v97_v34 = vld [vmem:[#allocation5 + $0x68] sm:$0xff]  ;;  %v623_v35 = vpack.c.bf16 %v199_v31, %v198_v30  ;;  %v200_v36 = vld [vmem:[#allocation7 + $0x50] sm:$0xff]  ;;  %v102_v5 = vshrl.u32 %v101_v4, 7 }
  0x52   :  { %584 = vmatprep.subr.bf16.mxu0 %v583_v8  ;;  %v201_v37 = vld [vmem:[#allocation7 + $0x58] sm:$0xff]  ;;  %v599_v38 = vpack.c.bf16 %v97_v34, %v96_v33  ;;  %v98_v39 = vld [vmem:[#allocation5 + $0x70] sm:$0xff]  ;;  %v202_v44 = vld [vmem:[#allocation7 + $0x60] sm:$0xff] }
  0x53   :  { %v99_v40 = vld [vmem:[#allocation5 + $0x78] sm:$0xff]  ;;  %v627_v41 = vpack.c.bf16 %v201_v37, %v200_v36  ;;  %v203_v45 = vld [vmem:[#allocation7 + $0x68] sm:$0xff]  ;;  %v204_v47 = vld [vmem:[#allocation7 + $0x70] sm:$0xff]  ;;  %v103_v6 = vsub.s32 0, %v102_v5 }
  0x54   :  { %614 = vmatpush3.bf16.msra.mxu1 %v611_v17  ;;  %v603_v42 = vpack.c.bf16 %v99_v40, %v98_v39  ;;  %v83_v43 = vld [vmem:[#allocation2 + $0x8] sm:$0xff]  ;;  %v631_v46 = vpack.c.bf16 %v203_v45, %v202_v44  ;;  %v296_v50 = vld [vmem:[#allocation8] sm:$0xff]  ;;  %v297_v51 = vld [vmem:[#allocation8 + $0x8] sm:$0xff] }
  0x55   :  { %586 = vmatpush3.bf16.msra.mxu0 %v583_v8  ;;  %616 = vmatprep.subr.bf16.mxu1 %v615_v23  ;;  %v205_v48 = vld [vmem:[#allocation7 + $0x78] sm:$0xff]  ;;  %v298_v52 = vld [vmem:[#allocation8 + $0x10] sm:$0xff]  ;;  %v639_v53 = vpack.c.bf16 %v297_v51, %v296_v50  ;;  %v300_v56 = vld [vmem:[#allocation8 + $0x20] sm:$0xff]  ;;  %v184_v8 = vsub.s32 1, %v102_v5 }
  0x56   :  { %588 = vmatprep.subr.bf16.mxu0 %v587_v20  ;;  %v635_v49 = vpack.c.bf16 %v205_v48, %v204_v47  ;;  %v299_v54 = vld [vmem:[#allocation8 + $0x18] sm:$0xff]  ;;  %v301_v57 = vld [vmem:[#allocation8 + $0x28] sm:$0xff]  ;;  %v302_v59 = vld [vmem:[#allocation8 + $0x30] sm:$0xff] }
  0x57   :  { %v643_v55 = vpack.c.bf16 %v299_v54, %v298_v52  ;;  %v647_v58 = vpack.c.bf16 %v301_v57, %v300_v56  ;;  %v303_v60 = vld [vmem:[#allocation8 + $0x38] sm:$0xff]  ;;  %v304_v62 = vld [vmem:[#allocation8 + $0x40] sm:$0xff]  ;;  %v305_v63 = vld [vmem:[#allocation8 + $0x48] sm:$0xff] }
  0x58   :  { %618 = vmatpush3.bf16.msra.mxu1 %v615_v23  ;;  %v651_v61 = vpack.c.bf16 %v303_v60, %v302_v59  ;;  %v655_v0 = vpack.c.bf16 %v305_v63, %v304_v62  ;;  %v306_v1 = vld [vmem:[#allocation8 + $0x50] sm:$0xff]  ;;  %v307_v2 = vld [vmem:[#allocation8 + $0x58] sm:$0xff]  ;;  %v308_v19 = vld [vmem:[#allocation8 + $0x60] sm:$0xff] }
  0x59   :  { %590 = vmatpush3.bf16.msra.mxu0 %v587_v20  ;;  %620 = vmatprep.subr.bf16.mxu1 %v619_v29  ;;  %v659_v3 = vpack.c.bf16 %v307_v2, %v306_v1  ;;  %v100_v7 = vld [vmem:[%s943_s2] sm:$0x3]  ;;  %v309_v20 = vld [vmem:[#allocation8 + $0x68] sm:$0xff]  ;;  %v311_v23 = vld [vmem:[#allocation8 + $0x78] sm:$0xff] }
  0x5a   :  { %592 = vmatprep.subr.bf16.mxu0 %v591_v26  ;;  %v104_v9 = vrot.slane %v100_v7, %v103_v6  ;;  %v185_v10 = vrot.slane %v100_v7, %v184_v8  ;;  %v663_v21 = vpack.c.bf16 %v309_v20, %v308_v19  ;;  %v310_v22 = vld [vmem:[#allocation8 + $0x70] sm:$0xff] }
  0x5b   :  { %v667_v24 = vpack.c.bf16 %v311_v23, %v310_v22  ;;  %v206_v25 = vld [vmem:[%s945_s4] sm:$0x3]  ;;  %s401_s4 = sshll.u32 %s802_s8, 4  ;;  %s402_s4 = int_to_ptr.vmem [resolvable:$true] %s401_s4 }
  0x5c   :  { %622 = vmatpush3.bf16.msra.mxu1 %v619_v29  ;;  %v291_v27 = vrot.slane %v206_v25, %v184_v8  ;;  %v415_v36 = vld [vmem:[%s947_s6] ss:$0 sm:$0xff]  ;;  %s766_s9 = scalar_lea.vmem %s402_s4, 256  ;;  %p771_p5 = scmp.lt.s32.totalorder %s402_s4, %s402_s4 }
  0x5d   :  { %594 = vmatpush3.bf16.msra.mxu0 %v591_v26  ;;  %624 = vmatprep.subr.bf16.mxu1 %v623_v35  ;;  %v210_v26 = vrot.slane %v206_v25, %v103_v6  ;;  %p767_p4 = scmp.ne.s32.totalorder %s402_s4, %s766_s9  ;;  %p772_p6 = scmp.lt.s32.totalorder %s766_s9, %s766_s9 }
  0x5e   :  { %596 = vmatprep.subr.bf16.mxu0 %v595_v32 }
  0x5f   :  { %p773_p7 = por %p772_p6, %p771_p5 }
  0x60   :  { %626 = vmatpush3.bf16.msra.mxu1 %v623_v35 }
  0x61   :  { %598 = vmatpush3.bf16.msra.mxu0 %v595_v32  ;;  %628 = vmatprep.subr.bf16.mxu1 %v627_v41  ;;  %p774_p8 = pnand %p773_p7, %p767_p4 }
  0x62   :  { %600 = vmatprep.subr.bf16.mxu0 %v599_v38 }
  0x64   :  { %630 = vmatpush3.bf16.msra.mxu1 %v627_v41 }
  0x65   :  { %602 = vmatpush3.bf16.msra.mxu0 %v599_v38  ;;  %632 = vmatprep.subr.bf16.mxu1 %v631_v46 }
  0x66   :  { %604 = vmatprep.subr.bf16.mxu0 %v603_v42 }
  0x68   :  { %634 = vmatpush3.bf16.msra.mxu1 %v631_v46 }
  0x69   :  { %606 = vmatpush3.bf16.msra.mxu0 %v603_v42  ;;  %636 = vmatprep.subr.bf16.mxu1 %v635_v49 }
  0x6a   :  { %640 = vmatprep.subr.bf16.mxu0 %v639_v53 }
  0x6c   :  { %503 = vmatmul.mubr.f32.vlgmr.msra.gmra.mrb[0].mxu0 %v83_v43  ;;  %638 = vmatpush3.bf16.msra.mxu1 %v635_v49 }
  0x6d   :  { %642 = vmatpush3.bf16.msra.mxu0 %v639_v53 }
  0x6e   :  { %644 = vmatprep.subr.bf16.mxu0 %v643_v55 }
  0x71   :  { %646 = vmatpush3.bf16.msra.mxu0 %v643_v55 }
  0x72   :  { %648 = vmatprep.subr.bf16.mxu0 %v647_v58 }
  0x75   :  { %650 = vmatpush3.bf16.msra.mxu0 %v647_v58 }
  0x76   :  { %652 = vmatprep.subr.bf16.mxu0 %v651_v61 }
  0x79   :  { %654 = vmatpush3.bf16.msra.mxu0 %v651_v61 }
  0x7a   :  { %656 = vmatprep.subr.bf16.mxu0 %v655_v0 }
  0x7d   :  { %658 = vmatpush3.bf16.msra.mxu0 %v655_v0 }
  0x7e   :  { %660 = vmatprep.subr.bf16.mxu0 %v659_v3 }
  0x81   :  { %662 = vmatpush3.bf16.msra.mxu0 %v659_v3 }
  0x82   :  { %664 = vmatprep.subr.bf16.mxu0 %v663_v21 }
  0x85   :  { %666 = vmatpush3.bf16.msra.mxu0 %v663_v21 }
  0x86   :  { %668 = vmatprep.subr.bf16.mxu0 %v667_v24 }
  0x89   :  { %670 = vmatpush3.bf16.msra.mxu0 %v667_v24 }
 0x13f   :  { %v504_v11 = vpop.f32.mrb[0].mxu0 }
 0x140   :  { %v177_v12 = vadd.f32 %v504_v11, %v104_v9  ;;  %v171_v13 = vpop.f32.mrb[1].mxu0 }
 0x141   :  { %v172_v14 = vadd.f32 %v171_v13, %v104_v9 }
 0x142   :  { %v187_v15 = vmul.f32 %v185_v10, %v177_v12  ;;  %vm181_vm1 = vcmp.gt.f32.partialorder %v177_v12, 0.0 }
 0x143   :  { %vm180_vm0 = vcmp.gt.f32.partialorder %v172_v14, 0.0  ;;  %v186_v16 = vmul.f32 %v185_v10, %v172_v14 }
 0x144   :  { %v189_v18 = vsel %vm181_vm1, %v177_v12, %v187_v15 }
 0x145   :  { %v188_v17 = vsel %vm180_vm0, %v172_v14, %v186_v16 }
 0x146   :  { %537 = vmatprep.mubr.f32.mxu1 %v188_v17 }
 0x147   :  { %538 = vmatmul.mubr.f32.vlgmr.msra.gmra.mrb[0].mxu1 %v189_v18 }
 0x21a   :  { %v539_v28 = vpop.f32.mrb[0].mxu1 }
 0x21b   :  { %v283_v29 = vadd.f32 %v539_v28, %v210_v26  ;;  %v277_v30 = vpop.f32.mrb[1].mxu1 }
 0x21c   :  { %v278_v31 = vadd.f32 %v277_v30, %v210_v26 }
 0x21d   :  { %v293_v32 = vmul.f32 %v291_v27, %v283_v29  ;;  %vm287_vm2 = vcmp.gt.f32.partialorder %v283_v29, 0.0 }
 0x21e   :  { %v292_v33 = vmul.f32 %v291_v27, %v278_v31  ;;  %vm286_vm3 = vcmp.gt.f32.partialorder %v278_v31, 0.0 }
 0x21f   :  { %v295_v35 = vsel %vm287_vm2, %v283_v29, %v293_v32 }
 0x220   :  { %v294_v34 = vsel %vm286_vm3, %v278_v31, %v292_v33 }
 0x221   :  { %572 = vmatprep.mubr.f32.mxu0 %v294_v34 }
 0x222   :  { %573 = vmatmul.mubr.f32.vlgmr.msra.gmra.mrb[2].mxu0 %v295_v35 }
 0x2f5   :  { %v574_v37 = vpop.f32.mrb[2].mxu0 }
 0x2f6   :  { %v391_v38 = vadd.f32 %v574_v37, %v415_v36  ;;  %v385_v39 = vpop.f32.mrb[3].mxu0 }
 0x2f7   :  { %v386_v40 = vadd.f32 %v415_v36, %v385_v39 }
 0x2f8   :  { %395 = vst [vmem:[#allocation10 + $0x8] sm:$0xff] %v391_v38 }
 0x2f9   :  { %394 = vst [vmem:[#allocation10] sm:$0xff] %v386_v40 }
 0x2fa   :  { %777 = shalt.err (!%p774_p8)
}
 0x2fb   :  { %s778_s6 = scalar_lea.hbm %s948_s7, 256 }
 0x2fc   :  { %p779_p9 = scmp.ne.s32.totalorder %s948_s7, %s778_s6  ;;  %p782_p10 = scmp.lt.u32.totalorder %s778_s6, %s948_s7 }
 0x2fe   :  { %p784_p11 = pnand %p782_p10, %p779_p9 }
 0x300   :  { %787 = shalt.err (!%p784_p11)
}
 0x301   :  { %407 = dma.vmem_to_hbm [thread:$0]  %s402_s4, 256, %s948_s7, [#allocation4], %s798_s13, %s798_s13, %s799_s14  }
 0x302   :  { %794 = dma.done.wait [#allocation4], 256  }
 0x303   :  { %795 = vsyncadd [#allocation4], 4294967040 }
 0x304   :  { %411 = vsyncpa [#allocation3], 1 }
 0x305   :  { %412 = vsyncpa [#allocation6], 1 }
 0x306   :  { %413 = vsyncpa [#allocation9], 1 }
 0x307   :  { %414 = vsyncpa [#allocation4], 1 }

// kernel: tpu_custom_call.1
= control target key start
LH: loop header
LB: loop body
LE: loop exit
PB: predicated region body
PF: predicated region fallthrough
CT: control target
= control target key end

     0   :  { %12 = vsyncpa [#allocation3], 0  ;;  %s941_s0 = inlined_call_operand.hbm [shape: f32[16,128], index: 0, kind: input, shape index: {}]   ;;  %s942_s1 = inlined_call_operand.hbm [shape: f32[128,128], index: 1, kind: input, shape index: {}]   ;;  %s943_s2 = inlined_call_operand.vmem [shape: f32[2,128], index: 2, kind: input, shape index: {}]   ;;  %s944_s3 = inlined_call_operand.hbm [shape: f32[128,128], index: 3, kind: input, shape index: {}]   ;;  %s945_s4 = inlined_call_operand.vmem [shape: f32[2,128], index: 4, kind: input, shape index: {}]   ;;  %s946_s5 = inlined_call_operand.hbm [shape: f32[128,128], index: 5, kind: input, shape index: {}]   ;;  %s947_s6 = inlined_call_operand.vmem [shape: f32[1,128], index: 6, kind: input, shape index: {}]   ;;  %s948_s7 = inlined_call_operand.hbm [shape: f32[16,128], index: 7, kind: output, shape index: {}]  }
   0x1   :  { %13 = vsyncpa [#allocation6], 0 }
   0x2   :  { %14 = vsyncpa [#allocation9], 0 }
   0x3   :  { %15 = vsyncpa [#allocation4], 0  ;;  %s796_s24 = smov [#allocation5]   ;;  %s797_s26 = smov [#allocation2]  }
   0x4   :  { %s33_s25 = sshll.u32 %s796_s24, 4  ;;  %s21_s27 = sshll.u32 %s797_s26, 4  ;;  %s34_s25 = int_to_ptr.vmem [resolvable:$true] %s33_s25  ;;  %s843_s27 = int_to_ptr.vmem [resolvable:$true] %s21_s27 }
   0x5   :  { %s678_s30 = scalar_lea.hbm %s942_s1, 2048 }
   0x6   :  { %p679_p0 = scmp.ne.s32.totalorder %s942_s1, %s678_s30  ;;  %p682_p1 = scmp.lt.u32.totalorder %s678_s30, %s942_s1 }
   0x8   :  { %p684_p2 = pnand %p682_p1, %p679_p0 }
   0xa   :  { %687 = shalt.err (!%p684_p2)
}
   0xb   :  { %s688_s12 = scalar_lea.vmem %s34_s25, 2048  ;;  %p693_p4 = scmp.lt.s32.totalorder %s34_s25, %s34_s25 }
   0xc   :  { %p689_p3 = scmp.ne.s32.totalorder %s34_s25, %s688_s12  ;;  %p694_p5 = scmp.lt.s32.totalorder %s688_s12, %s688_s12 }
   0xe   :  { %p695_p6 = por %p694_p5, %p693_p4 }
  0x10   :  { %p696_p7 = pnand %p695_p6, %p689_p3 }
  0x12   :  { %699 = shalt.err (!%p696_p7)
}
  0x13   :  { %s798_s13 = smov 128   ;;  %s799_s14 = smov 8  }
  0x14   :  { %39 = dma.hbm_to_vmem [thread:$0]  %s942_s1, 2048, %s34_s25, [#allocation6], %s798_s13, %s798_s13, %s799_s14  }
  0x15   :  { %s700_s19 = scalar_lea.hbm %s941_s0, 256 }
  0x16   :  { %p701_p8 = scmp.ne.s32.totalorder %s941_s0, %s700_s19  ;;  %p704_p9 = scmp.lt.u32.totalorder %s700_s19, %s941_s0 }
  0x18   :  { %p706_p10 = pnand %p704_p9, %p701_p8 }
  0x1a   :  { %709 = shalt.err (!%p706_p10)
}
  0x1b   :  { %s710_s24 = scalar_lea.vmem %s843_s27, 256  ;;  %p715_p12 = scmp.lt.s32.totalorder %s843_s27, %s843_s27 }
  0x1c   :  { %p711_p11 = scmp.ne.s32.totalorder %s843_s27, %s710_s24  ;;  %p716_p13 = scmp.lt.s32.totalorder %s710_s24, %s710_s24 }
  0x1e   :  { %p717_p0 = por %p716_p13, %p715_p12 }
  0x20   :  { %p718_p1 = pnand %p717_p0, %p711_p11 }
  0x22   :  { %721 = shalt.err (!%p718_p1)
}
  0x23   :  { %27 = dma.hbm_to_vmem [thread:$0]  %s941_s0, 256, %s843_s27, [#allocation3], %s798_s13, %s798_s13, %s799_s14  }
  0x24   :  { %s800_s26 = smov [#allocation7]   ;;  %s801_s29 = smov [#allocation8]  }
  0x25   :  { %s47_s28 = sshll.u32 %s800_s26, 4  ;;  %s61_s30 = sshll.u32 %s801_s29, 4  ;;  %s48_s28 = int_to_ptr.vmem [resolvable:$true] %s47_s28  ;;  %s880_s30 = int_to_ptr.vmem [resolvable:$true] %s61_s30 }
  0x26   :  { %s722_s10 = scalar_lea.hbm %s944_s3, 2048 }
  0x27   :  { %p723_p2 = scmp.ne.s32.totalorder %s944_s3, %s722_s10  ;;  %p726_p3 = scmp.lt.u32.totalorder %s722_s10, %s944_s3 }
  0x29   :  { %p728_p4 = pnand %p726_p3, %p723_p2 }
  0x2b   :  { %731 = shalt.err (!%p728_p4)
}
  0x2c   :  { %s732_s0 = scalar_lea.vmem %s48_s28, 2048  ;;  %p737_p6 = scmp.lt.s32.totalorder %s48_s28, %s48_s28 }
  0x2d   :  { %p733_p5 = scmp.ne.s32.totalorder %s48_s28, %s732_s0  ;;  %p738_p7 = scmp.lt.s32.totalorder %s732_s0, %s732_s0 }
  0x2f   :  { %p739_p8 = por %p738_p7, %p737_p6 }
  0x31   :  { %p740_p9 = pnand %p739_p8, %p733_p5 }
  0x33   :  { %743 = shalt.err (!%p740_p9)
}
  0x34   :  { %53 = dma.hbm_to_vmem [thread:$0]  %s944_s3, 2048, %s48_s28, [#allocation6], %s798_s13, %s798_s13, %s799_s14  }
  0x35   :  { %s744_s20 = scalar_lea.hbm %s946_s5, 2048 }
  0x36   :  { %p745_p10 = scmp.ne.s32.totalorder %s946_s5, %s744_s20  ;;  %p748_p11 = scmp.lt.u32.totalorder %s744_s20, %s946_s5 }
  0x38   :  { %p750_p12 = pnand %p748_p11, %p745_p10 }
  0x3a   :  { %753 = shalt.err (!%p750_p12)
}
  0x3b   :  { %s754_s1 = scalar_lea.vmem %s880_s30, 2048  ;;  %p759_p0 = scmp.lt.s32.totalorder %s880_s30, %s880_s30 }
  0x3c   :  { %p755_p13 = scmp.ne.s32.totalorder %s880_s30, %s754_s1  ;;  %p760_p1 = scmp.lt.s32.totalorder %s754_s1, %s754_s1 }
  0x3e   :  { %p761_p2 = por %p760_p1, %p759_p0 }
  0x40   :  { %p762_p3 = pnand %p761_p2, %p755_p13 }
  0x42   :  { %765 = shalt.err (!%p762_p3)
}
  0x43   :  { %67 = dma.hbm_to_vmem [thread:$0]  %s946_s5, 2048, %s880_s30, [#allocation9], %s798_s13, %s798_s13, %s799_s14  }
  0x44   :  { %788 = dma.done.wait [#allocation3], 256  }
  0x45   :  { %789 = vsyncadd [#allocation3], 4294967040 }
  0x46   :  { %790 = dma.done.wait [#allocation6], 4096  }
  0x47   :  { %791 = vsyncadd [#allocation6], 4294963200 }
  0x48   :  { %792 = dma.done.wait [#allocation9], 2048  }
  0x49   :  { %793 = vsyncadd [#allocation9], 4294965248  ;;  %v84_v0 = vld [vmem:[#allocation5] sm:$0xff]  ;;  %v85_v1 = vld [vmem:[#allocation5 + $0x8] sm:$0xff]  ;;  %s802_s8 = smov [#allocation10]  }
  0x4a   :  { %v86_v2 = vld [vmem:[#allocation5 + $0x10] sm:$0xff]  ;;  %v575_v3 = vpack.c.bf16 %v85_v1, %v84_v0  ;;  %v87_v4 = vld [vmem:[#allocation5 + $0x18] sm:$0xff]  ;;  %v88_v6 = vld [vmem:[#allocation5 + $0x20] sm:$0xff] }
  0x4b   :  { %v579_v5 = vpack.c.bf16 %v87_v4, %v86_v2  ;;  %v89_v7 = vld [vmem:[#allocation5 + $0x28] sm:$0xff]  ;;  %v90_v9 = vld [vmem:[#allocation5 + $0x30] sm:$0xff]  ;;  %v91_v10 = vld [vmem:[#allocation5 + $0x38] sm:$0xff]  ;;  %v101_v4 = vlaneseq }
  0x4c   :  { %576 = vmatprep.subr.bf16.mxu0 %v575_v3  ;;  %v583_v8 = vpack.c.bf16 %v89_v7, %v88_v6  ;;  %v82_v11 = vld [vmem:[#allocation2] sm:$0xff]  ;;  %v190_v12 = vld [vmem:[#allocation7] sm:$0xff]  ;;  %v191_v13 = vld [vmem:[#allocation7 + $0x8] sm:$0xff]  ;;  %v587_v20 = vpack.c.bf16 %v91_v10, %v90_v9 }
  0x4d   :  { %578 = vmatpush3.bf16.msra.mxu0 %v575_v3  ;;  %502 = vmatprep.mubr.f32.mxu0 %v82_v11  ;;  %v192_v14 = vld [vmem:[#allocation7 + $0x10] sm:$0xff]  ;;  %v607_v15 = vpack.c.bf16 %v191_v13, %v190_v12  ;;  %v193_v16 = vld [vmem:[#allocation7 + $0x18] sm:$0xff]  ;;  %v194_v18 = vld [vmem:[#allocation7 + $0x20] sm:$0xff] }
  0x4e   :  { %580 = vmatprep.subr.bf16.mxu0 %v579_v5  ;;  %v611_v17 = vpack.c.bf16 %v193_v16, %v192_v14  ;;  %v195_v19 = vld [vmem:[#allocation7 + $0x28] sm:$0xff]  ;;  %v92_v21 = vld [vmem:[#allocation5 + $0x40] sm:$0xff]  ;;  %v196_v24 = vld [vmem:[#allocation7 + $0x30] sm:$0xff] }
  0x4f   :  { %608 = vmatprep.subr.bf16.mxu1 %v607_v15  ;;  %v93_v22 = vld [vmem:[#allocation5 + $0x48] sm:$0xff]  ;;  %v615_v23 = vpack.c.bf16 %v195_v19, %v194_v18  ;;  %v197_v25 = vld [vmem:[#allocation7 + $0x38] sm:$0xff]  ;;  %v94_v27 = vld [vmem:[#allocation5 + $0x50] sm:$0xff] }
  0x50   :  { %610 = vmatpush3.bf16.msra.mxu1 %v607_v15  ;;  %v591_v26 = vpack.c.bf16 %v93_v22, %v92_v21  ;;  %v95_v28 = vld [vmem:[#allocation5 + $0x58] sm:$0xff]  ;;  %v619_v29 = vpack.c.bf16 %v197_v25, %v196_v24  ;;  %v198_v30 = vld [vmem:[#allocation7 + $0x40] sm:$0xff]  ;;  %v199_v31 = vld [vmem:[#allocation7 + $0x48] sm:$0xff] }
  0x51   :  { %582 = vmatpush3.bf16.msra.mxu0 %v579_v5  ;;  %612 = vmatprep.subr.bf16.mxu1 %v611_v17  ;;  %v595_v32 = vpack.c.bf16 %v95_v28, %v94_v27  ;;  %v96_v33 = vld [vmem:[#allocation5 + $0x60] sm:$0xff]  ;;  %v97_v34 = vld [vmem:[#allocation5 + $0x68] sm:$0xff]  ;;  %v623_v35 = vpack.c.bf16 %v199_v31, %v198_v30  ;;  %v200_v36 = vld [vmem:[#allocation7 + $0x50] sm:$0xff]  ;;  %v102_v5 = vshrl.u32 %v101_v4, 7 }
  0x52   :  { %584 = vmatprep.subr.bf16.mxu0 %v583_v8  ;;  %v201_v37 = vld [vmem:[#allocation7 + $0x58] sm:$0xff]  ;;  %v599_v38 = vpack.c.bf16 %v97_v34, %v96_v33  ;;  %v98_v39 = vld [vmem:[#allocation5 + $0x70] sm:$0xff]  ;;  %v202_v44 = vld [vmem:[#allocation7 + $0x60] sm:$0xff] }
  0x53   :  { %v99_v40 = vld [vmem:[#allocation5 + $0x78] sm:$0xff]  ;;  %v627_v41 = vpack.c.bf16 %v201_v37, %v200_v36  ;;  %v203_v45 = vld [vmem:[#allocation7 + $0x68] sm:$0xff]  ;;  %v204_v47 = vld [vmem:[#allocation7 + $0x70] sm:$0xff]  ;;  %v103_v6 = vsub.s32 0, %v102_v5 }
  0x54   :  { %614 = vmatpush3.bf16.msra.mxu1 %v611_v17  ;;  %v603_v42 = vpack.c.bf16 %v99_v40, %v98_v39  ;;  %v83_v43 = vld [vmem:[#allocation2 + $0x8] sm:$0xff]  ;;  %v631_v46 = vpack.c.bf16 %v203_v45, %v202_v44  ;;  %v296_v50 = vld [vmem:[#allocation8] sm:$0xff]  ;;  %v297_v51 = vld [vmem:[#allocation8 + $0x8] sm:$0xff] }
  0x55   :  { %586 = vmatpush3.bf16.msra.mxu0 %v583_v8  ;;  %616 = vmatprep.subr.bf16.mxu1 %v615_v23  ;;  %v205_v48 = vld [vmem:[#allocation7 + $0x78] sm:$0xff]  ;;  %v298_v52 = vld [vmem:[#allocation8 + $0x10] sm:$0xff]  ;;  %v639_v53 = vpack.c.bf16 %v297_v51, %v296_v50  ;;  %v300_v56 = vld [vmem:[#allocation8 + $0x20] sm:$0xff]  ;;  %v184_v8 = vsub.s32 1, %v102_v5 }
  0x56   :  { %588 = vmatprep.subr.bf16.mxu0 %v587_v20  ;;  %v635_v49 = vpack.c.bf16 %v205_v48, %v204_v47  ;;  %v299_v54 = vld [vmem:[#allocation8 + $0x18] sm:$0xff]  ;;  %v301_v57 = vld [vmem:[#allocation8 + $0x28] sm:$0xff]  ;;  %v302_v59 = vld [vmem:[#allocation8 + $0x30] sm:$0xff] }
  0x57   :  { %v643_v55 = vpack.c.bf16 %v299_v54, %v298_v52  ;;  %v647_v58 = vpack.c.bf16 %v301_v57, %v300_v56  ;;  %v303_v60 = vld [vmem:[#allocation8 + $0x38] sm:$0xff]  ;;  %v304_v62 = vld [vmem:[#allocation8 + $0x40] sm:$0xff]  ;;  %v305_v63 = vld [vmem:[#allocation8 + $0x48] sm:$0xff] }
  0x58   :  { %618 = vmatpush3.bf16.msra.mxu1 %v615_v23  ;;  %v651_v61 = vpack.c.bf16 %v303_v60, %v302_v59  ;;  %v655_v0 = vpack.c.bf16 %v305_v63, %v304_v62  ;;  %v306_v1 = vld [vmem:[#allocation8 + $0x50] sm:$0xff]  ;;  %v307_v2 = vld [vmem:[#allocation8 + $0x58] sm:$0xff]  ;;  %v308_v19 = vld [vmem:[#allocation8 + $0x60] sm:$0xff] }
  0x59   :  { %590 = vmatpush3.bf16.msra.mxu0 %v587_v20  ;;  %620 = vmatprep.subr.bf16.mxu1 %v619_v29  ;;  %v659_v3 = vpack.c.bf16 %v307_v2, %v306_v1  ;;  %v100_v7 = vld [vmem:[%s943_s2] sm:$0x3]  ;;  %v309_v20 = vld [vmem:[#allocation8 + $0x68] sm:$0xff]  ;;  %v311_v23 = vld [vmem:[#allocation8 + $0x78] sm:$0xff] }
  0x5a   :  { %592 = vmatprep.subr.bf16.mxu0 %v591_v26  ;;  %v104_v9 = vrot.slane %v100_v7, %v103_v6  ;;  %v185_v10 = vrot.slane %v100_v7, %v184_v8  ;;  %v663_v21 = vpack.c.bf16 %v309_v20, %v308_v19  ;;  %v310_v22 = vld [vmem:[#allocation8 + $0x70] sm:$0xff] }
  0x5b   :  { %v667_v24 = vpack.c.bf16 %v311_v23, %v310_v22  ;;  %v206_v25 = vld [vmem:[%s945_s4] sm:$0x3]  ;;  %s401_s4 = sshll.u32 %s802_s8, 4  ;;  %s402_s4 = int_to_ptr.vmem [resolvable:$true] %s401_s4 }
  0x5c   :  { %622 = vmatpush3.bf16.msra.mxu1 %v619_v29  ;;  %v291_v27 = vrot.slane %v206_v25, %v184_v8  ;;  %v415_v36 = vld [vmem:[%s947_s6] ss:$0 sm:$0xff]  ;;  %s766_s9 = scalar_lea.vmem %s402_s4, 256  ;;  %p771_p5 = scmp.lt.s32.totalorder %s402_s4, %s402_s4 }
  0x5d   :  { %594 = vmatpush3.bf16.msra.mxu0 %v591_v26  ;;  %624 = vmatprep.subr.bf16.mxu1 %v623_v35  ;;  %v210_v26 = vrot.slane %v206_v25, %v103_v6  ;;  %p767_p4 = scmp.ne.s32.totalorder %s402_s4, %s766_s9  ;;  %p772_p6 = scmp.lt.s32.totalorder %s766_s9, %s766_s9 }
  0x5e   :  { %596 = vmatprep.subr.bf16.mxu0 %v595_v32 }
  0x5f   :  { %p773_p7 = por %p772_p6, %p771_p5 }
  0x60   :  { %626 = vmatpush3.bf16.msra.mxu1 %v623_v35 }
  0x61   :  { %598 = vmatpush3.bf16.msra.mxu0 %v595_v32  ;;  %628 = vmatprep.subr.bf16.mxu1 %v627_v41  ;;  %p774_p8 = pnand %p773_p7, %p767_p4 }
  0x62   :  { %600 = vmatprep.subr.bf16.mxu0 %v599_v38 }
  0x64   :  { %630 = vmatpush3.bf16.msra.mxu1 %v627_v41 }
  0x65   :  { %602 = vmatpush3.bf16.msra.mxu0 %v599_v38  ;;  %632 = vmatprep.subr.bf16.mxu1 %v631_v46 }
  0x66   :  { %604 = vmatprep.subr.bf16.mxu0 %v603_v42 }
  0x68   :  { %634 = vmatpush3.bf16.msra.mxu1 %v631_v46 }
  0x69   :  { %606 = vmatpush3.bf16.msra.mxu0 %v603_v42  ;;  %636 = vmatprep.subr.bf16.mxu1 %v635_v49 }
  0x6a   :  { %640 = vmatprep.subr.bf16.mxu0 %v639_v53 }
  0x6c   :  { %503 = vmatmul.mubr.f32.vlgmr.msra.gmra.mrb[0].mxu0 %v83_v43  ;;  %638 = vmatpush3.bf16.msra.mxu1 %v635_v49 }
  0x6d   :  { %642 = vmatpush3.bf16.msra.mxu0 %v639_v53 }
  0x6e   :  { %644 = vmatprep.subr.bf16.mxu0 %v643_v55 }
  0x71   :  { %646 = vmatpush3.bf16.msra.mxu0 %v643_v55 }
  0x72   :  { %648 = vmatprep.subr.bf16.mxu0 %v647_v58 }
  0x75   :  { %650 = vmatpush3.bf16.msra.mxu0 %v647_v58 }
  0x76   :  { %652 = vmatprep.subr.bf16.mxu0 %v651_v61 }
  0x79   :  { %654 = vmatpush3.bf16.msra.mxu0 %v651_v61 }
  0x7a   :  { %656 = vmatprep.subr.bf16.mxu0 %v655_v0 }
  0x7d   :  { %658 = vmatpush3.bf16.msra.mxu0 %v655_v0 }
  0x7e   :  { %660 = vmatprep.subr.bf16.mxu0 %v659_v3 }
  0x81   :  { %662 = vmatpush3.bf16.msra.mxu0 %v659_v3 }
  0x82   :  { %664 = vmatprep.subr.bf16.mxu0 %v663_v21 }
  0x85   :  { %666 = vmatpush3.bf16.msra.mxu0 %v663_v21 }
  0x86   :  { %668 = vmatprep.subr.bf16.mxu0 %v667_v24 }
  0x89   :  { %670 = vmatpush3.bf16.msra.mxu0 %v667_v24 }
 0x13f   :  { %v504_v11 = vpop.f32.mrb[0].mxu0 }
 0x140   :  { %v177_v12 = vadd.f32 %v504_v11, %v104_v9  ;;  %v171_v13 = vpop.f32.mrb[1].mxu0 }
 0x141   :  { %v172_v14 = vadd.f32 %v171_v13, %v104_v9 }
 0x142   :  { %v187_v15 = vmul.f32 %v185_v10, %v177_v12  ;;  %vm181_vm1 = vcmp.gt.f32.partialorder %v177_v12, 0.0 }
 0x143   :  { %vm180_vm0 = vcmp.gt.f32.partialorder %v172_v14, 0.0  ;;  %v186_v16 = vmul.f32 %v185_v10, %v172_v14 }
 0x144   :  { %v189_v18 = vsel %vm181_vm1, %v177_v12, %v187_v15 }
 0x145   :  { %v188_v17 = vsel %vm180_vm0, %v172_v14, %v186_v16 }
 0x146   :  { %537 = vmatprep.mubr.f32.mxu1 %v188_v17 }
 0x147   :  { %538 = vmatmul.mubr.f32.vlgmr.msra.gmra.mrb[0].mxu1 %v189_v18 }
 0x21a   :  { %v539_v28 = vpop.f32.mrb[0].mxu1 }
 0x21b   :  { %v283_v29 = vadd.f32 %v539_v28, %v210_v26  ;;  %v277_v30 = vpop.f32.mrb[1].mxu1 }
 0x21c   :  { %v278_v31 = vadd.f32 %v277_v30, %v210_v26 }
 0x21d   :  { %v293_v32 = vmul.f32 %v291_v27, %v283_v29  ;;  %vm287_vm2 = vcmp.gt.f32.partialorder %v283_v29, 0.0 }
 0x21e   :  { %v292_v33 = vmul.f32 %v291_v27, %v278_v31  ;;  %vm286_vm3 = vcmp.gt.f32.partialorder %v278_v31, 0.0 }
 0x21f   :  { %v295_v35 = vsel %vm287_vm2, %v283_v29, %v293_v32 }
 0x220   :  { %v294_v34 = vsel %vm286_vm3, %v278_v31, %v292_v33 }
 0x221   :  { %572 = vmatprep.mubr.f32.mxu0 %v294_v34 }
 0x222   :  { %573 = vmatmul.mubr.f32.vlgmr.msra.gmra.mrb[2].mxu0 %v295_v35 }
 0x2f5   :  { %v574_v37 = vpop.f32.mrb[2].mxu0 }
 0x2f6   :  { %v391_v38 = vadd.f32 %v574_v37, %v415_v36  ;;  %v385_v39 = vpop.f32.mrb[3].mxu0 }
 0x2f7   :  { %v386_v40 = vadd.f32 %v415_v36, %v385_v39 }
 0x2f8   :  { %395 = vst [vmem:[#allocation10 + $0x8] sm:$0xff] %v391_v38 }
 0x2f9   :  { %394 = vst [vmem:[#allocation10] sm:$0xff] %v386_v40 }
 0x2fa   :  { %777 = shalt.err (!%p774_p8)
}
 0x2fb   :  { %s778_s6 = scalar_lea.hbm %s948_s7, 256 }
 0x2fc   :  { %p779_p9 = scmp.ne.s32.totalorder %s948_s7, %s778_s6  ;;  %p782_p10 = scmp.lt.u32.totalorder %s778_s6, %s948_s7 }
 0x2fe   :  { %p784_p11 = pnand %p782_p10, %p779_p9 }
 0x300   :  { %787 = shalt.err (!%p784_p11)
}
 0x301   :  { %407 = dma.vmem_to_hbm [thread:$0]  %s402_s4, 256, %s948_s7, [#allocation4], %s798_s13, %s798_s13, %s799_s14  }
 0x302   :  { %794 = dma.done.wait [#allocation4], 256  }
 0x303   :  { %795 = vsyncadd [#allocation4], 4294967040 }
 0x304   :  { %411 = vsyncpa [#allocation3], 1 }
 0x305   :  { %412 = vsyncpa [#allocation6], 1 }
 0x306   :  { %413 = vsyncpa [#allocation9], 1 }
 0x307   :  { %414 = vsyncpa [#allocation4], 1 }

</bundles_post_ra>
